<compile_context>
chip_gen: v6e
topology: v6e:2x2x1
jax: 0.10.0
libtpu: 0.0.40
codegen_flags: <defaults>
</compile_context>

<pallas_src>
import jax
import jax.numpy as jnp
from jax.experimental import pallas as pl
from jax.experimental.pallas import tpu as pltpu


def _round_up(x, m):
    return (x + m - 1) // m * m


def _cdiv(a, b):
    return -(-a // b)


# ------------------------- generation-aware VMEM budget -------------------------

def _vmem_budget_bytes():
    """Per-call VMEM working-set budget, derived from the chip's VMEM capacity."""
    cap = None
    try:
        info = pltpu.get_tpu_info()
        cap = getattr(info, "vmem_capacity_bytes", None)
    except Exception:
        cap = None
    if cap is None:
        cap = 64 * 1024 * 1024                      # conservative fallback
    if cap <= 64 * 1024 * 1024:                     # v7x: 64 MiB per TensorCore
        return 48 * 1024 * 1024
    return 100 * 1024 * 1024                        # v5e / v6e: 128 MiB physical


# ------------------------- tile selection -------------------------

def _select_tn(N):
    """Lane-dense N tile (multiple of 128); full N when narrow, <=512 otherwise."""
    Np128 = _round_up(N, 128)
    if Np128 <= 512:
        return Np128, Np128
    for tn in (512, 384, 256, 128):
        if Np128 % tn == 0:
            return tn, Np128
    return 128, Np128


def _working_set_bytes(tm, tk, tn, out_bytes, with_acc):
    """Double-buffered per-step VMEM working set for the chosen tiles."""
    ws = 2 * (tm * tk * 2        # bf16 activation tile
              + tk * tn * 2      # bf16 weight tile
              + tm * tn * out_bytes   # output tile
              + tn * 4)          # f32 bias tile
    if with_acc:
        ws += tm * tn * 4        # f32 accumulator scratch (single-buffered)
    return ws


def _select_tm(M, tk, tn, out_bytes, with_acc, n_blocks, budget):
    """Largest M tile that fits the VMEM budget while keeping >=2 parallel blocks."""
    if M <= 128:
        return _round_up(max(M, 16), 16)            # bf16-sublane-aligned single block
    chosen = 128
    for cand in (2048, 1024, 512, 256, 128):
        if _working_set_bytes(cand, tk, tn, out_bytes, with_acc) > budget:
            continue
        chosen = cand
        if _cdiv(M, cand) * n_blocks >= 2:          # keep v7x's second TC busy
            break
    return chosen


# ------------------------- Pallas kernels -------------------------

def _mm_bias_relu_kernel(x_ref, w_ref, b_ref, o_ref):
    """Weights-resident path: full-K matmul + bias + ReLU on one (tm, tn) tile."""
    acc = jnp.dot(x_ref[...], w_ref[...], preferred_element_type=jnp.float32)
    o_ref[...] = jnp.maximum(acc + b_ref[...], 0.0).astype(o_ref.dtype)


def _mm_bias_relu_ktiled_kernel(x_ref, w_ref, b_ref, o_ref, acc_ref):
    """Large-K fallback: K is the trailing 'arbitrary' reduction grid axis."""

    @pl.when(pl.program_id(2) == 0)
    def _init():
        acc_ref[...] = jnp.zeros_like(acc_ref)

    acc_ref[...] += jnp.dot(x_ref[...], w_ref[...],
                            preferred_element_type=jnp.float32)

    @pl.when(pl.program_id(2) == pl.num_programs(2) - 1)
    def _epilogue():
        o_ref[...] = jnp.maximum(acc_ref[...] + b_ref[...], 0.0).astype(o_ref.dtype)


def fused_matmul_bias_relu(cols, w_folded, bias, *,
                           out_dtype=jnp.float32, force_k_tiled=False):
    """relu(cols @ w_folded + bias).

    cols: (M, K), w_folded: (K, N), bias: (N,). MXU operands are bf16,
    accumulation / epilogue are f32; output dtype is `out_dtype`.
    """
    M, K = cols.shape
    Kw, N = w_folded.shape
    assert Kw == K, (Kw, K)
    out_bytes = jnp.dtype(out_dtype).itemsize
    budget = _vmem_budget_bytes()

    # ---- tile selection ----
    tn, Np = _select_tn(N)
    n_blocks = Np // tn

    Kp = _round_up(K, 128)                           # dense lanes, bf16 sublane packing
    weights_resident = ((not force_k_tiled)
                        and Kp * Np * 2 <= 16 * 1024 * 1024
                        and Kp <= 4096)
    if weights_resident:
        tk = Kp
    else:
        tk = 256 if K > 512 else Kp
        Kp = _round_up(K, tk)
    k_blocks = Kp // tk

    tm = _select_tm(M, tk, tn, out_bytes, not weights_resident, n_blocks, budget)
    Mp = _round_up(M, tm)
    m_blocks = Mp // tm

    # ---- zero-pad to tile multiples; MXU operands in bf16, bias in f32 ----
    x_p = jnp.pad(cols.astype(jnp.bfloat16), ((0, Mp - M), (0, Kp - K)))
    w_p = jnp.pad(w_folded.astype(jnp.bfloat16), ((0, Kp - K), (0, Np - N)))
    b_p = jnp.pad(bias.astype(jnp.float32), (0, Np - N)).reshape(1, Np)

    ws = _working_set_bytes(tm, tk, tn, out_bytes, not weights_resident)
    vmem_limit = int(min(budget, max(ws + (8 << 20), 16 << 20)))

    if weights_resident:
        # Grid (M, N): both parallel (megacore shardable); weight tile is
        # re-streamed once per M tile, activation row-slab fetched once.
        out_p = pl.pallas_call(
            _mm_bias_relu_kernel,
            out_shape=jax.ShapeDtypeStruct((Mp, Np), out_dtype),
            grid_spec=pltpu.PrefetchScalarGridSpec(
                num_scalar_prefetch=0,
                grid=(m_blocks, n_blocks),
                in_specs=[
                    pl.BlockSpec((tm, tk), lambda i, j: (i, 0)),   # activations (bf16)
                    pl.BlockSpec((tk, tn), lambda i, j: (0, j)),   # folded weights (bf16)
                    pl.BlockSpec((1, tn), lambda i, j: (0, j)),    # BN-folded bias (f32)
                ],
                out_specs=pl.BlockSpec((tm, tn), lambda i, j: (i, j)),
            ),
            compiler_params=pltpu.CompilerParams(
                dimension_semantics=("parallel", "parallel"),
                vmem_limit_bytes=vmem_limit,
            ),
            cost_estimate=pl.CostEstimate(
                flops=2 * Mp * Np * Kp,
                transcendentals=0,
                bytes_accessed=(Mp * Kp * 2                  # activations (once)
                                + m_blocks * Kp * Np * 2     # weights re-streamed / M tile
                                + m_blocks * Np * 4          # bias re-streamed / M tile
                                + Mp * Np * out_bytes),      # output (once)
            ),
        )(x_p, w_p, b_p)
    else:
        # Large-K fallback: K as trailing reduction axis with f32 accumulator.
        # TODO(synk): sweep pipeline_mode=pl.Buffered(3) on the streamed operands
        # if DMAs remain exposed after the tile-size changes.
        out_p = pl.pallas_call(
            _mm_bias_relu_ktiled_kernel,
            out_shape=jax.ShapeDtypeStruct((Mp, Np), out_dtype),
            grid_spec=pltpu.PrefetchScalarGridSpec(
                num_scalar_prefetch=0,
                grid=(m_blocks, n_blocks, k_blocks),
                in_specs=[
                    pl.BlockSpec((tm, tk), lambda i, j, k: (i, k)),
                    pl.BlockSpec((tk, tn), lambda i, j, k: (k, j)),
                    pl.BlockSpec((1, tn), lambda i, j, k: (0, j)),
                ],
                out_specs=pl.BlockSpec((tm, tn), lambda i, j, k: (i, j)),
                scratch_shapes=[pltpu.VMEM((tm, tn), jnp.float32)],
            ),
            compiler_params=pltpu.CompilerParams(
                dimension_semantics=("parallel", "parallel", "arbitrary"),
                vmem_limit_bytes=vmem_limit,
            ),
            cost_estimate=pl.CostEstimate(
                flops=2 * Mp * Np * Kp,
                transcendentals=0,
                bytes_accessed=(n_blocks * Mp * Kp * 2       # activations per N pass
                                + m_blocks * Kp * Np * 2     # weights per M pass
                                + m_blocks * Np * 4
                                + Mp * Np * out_bytes),
            ),
        )(x_p, w_p, b_p)

    return out_p[:M, :N]


# ------------------------- im2col glue (plain JAX, bf16) -------------------------
# TODO(synk): fuse im2col into the Pallas kernel as (kh, kw) 'arbitrary' reduction
# grid axes with pl.Element offsets for stride-1 convs; strided/offset input
# windows beyond that stay XLA-side glue for now.

def im2col(x_nhwc, k, stride, padding):
    N, H, W, C = x_nhwc.shape
    Ho = (H + 2 * padding - k) // stride + 1
    Wo = (W + 2 * padding - k) // stride + 1
    xp = jnp.pad(x_nhwc, ((0, 0), (padding, padding), (padding, padding), (0, 0)))
    patches = []
    for i in range(k):
        for j in range(k):
            patches.append(xp[:, i:i + stride * Ho:stride,
                              j:j + stride * Wo:stride, :])
    # Column order is (kh, kw, cin) -- must match the weight permutation below.
    cols = jnp.concatenate(patches, axis=-1)            # (N, Ho, Wo, k*k*C)
    return cols.reshape(N * Ho * Wo, k * k * C), (N, Ho, Wo)


# ------------------------- parameters & forward -------------------------

def init_conv_bn_relu(key, inp, outp, kernel_size, stride, padding, eps=1e-5):
    """Synthetic ConvBNReLu params (PyTorch layouts), BN folded for inference."""
    kw_, kg, kb, km, kv = jax.random.split(key, 5)
    w_oihw = 0.05 * jax.random.normal(
        kw_, (outp, inp, kernel_size, kernel_size), jnp.float32)   # Conv2d weight
    gamma = 1.0 + 0.1 * jax.random.normal(kg, (outp,), jnp.float32)
    beta = 0.1 * jax.random.normal(kb, (outp,), jnp.float32)
    running_mean = 0.1 * jax.random.normal(km, (outp,), jnp.float32)
    running_var = 1.0 + 0.1 * jax.random.uniform(kv, (outp,), jnp.float32)

    # BN fold is done in f32; only the final MXU operands are cast to bf16.
    scale = gamma / jnp.sqrt(running_var + eps)
    bias = beta - running_mean * scale
    # (cout, cin, kh, kw) -> (kh, kw, cin, cout) -> (kh*kw*cin, cout),
    # matching the im2col column order (kh, kw, cin).
    w_mat = jnp.transpose(w_oihw, (2, 3, 1, 0)).reshape(
        kernel_size * kernel_size * inp, outp)
    w_folded = w_mat * scale[None, :]

    return {
        "kernel_size": kernel_size, "stride": stride, "padding": padding,
        "w_folded": w_folded, "bias": bias,
        # raw params kept only for the plain-JAX reference check
        "w_oihw": w_oihw, "gamma": gamma, "beta": beta,
        "running_mean": running_mean, "running_var": running_var, "eps": eps,
    }


def conv_bn_relu_forward_nhwc(x_nhwc, params, *, out_dtype=jnp.float32):
    """NHWC in -> NHWC out. Preferred entry point for chaining layers
    (avoids NCHW<->NHWC transposes between ConvBNReLu blocks)."""
    x = x_nhwc.astype(jnp.bfloat16)     # bf16 im2col slab: halves k^2-expanded HBM traffic
    cols, (N, Ho, Wo) = im2col(x, params["kernel_size"], params["stride"],
                               params["padding"])
    out = fused_matmul_bias_relu(cols, params["w_folded"], params["bias"],
                                 out_dtype=out_dtype)
    return out.reshape(N, Ho, Wo, -1)


def conv_bn_relu_forward(x_nchw, params, *, out_dtype=jnp.float32):
    """Pallas forward of ConvBNReLu: NCHW in, NCHW out (matches PyTorch)."""
    x = jnp.transpose(x_nchw, (0, 2, 3, 1))                        # NCHW -> NHWC
    y = conv_bn_relu_forward_nhwc(x, params, out_dtype=out_dtype)
    return jnp.transpose(y, (0, 3, 1, 2))                          # NHWC -> NCHW


# ------------------------- plain-JAX reference (f32) -------------------------

def conv_bn_relu_reference(x_nchw, params):
    y = jax.lax.conv_general_dilated(
        x_nchw, params["w_oihw"],
        window_strides=(params["stride"], params["stride"]),
        padding=[(params["padding"], params["padding"])] * 2,
        dimension_numbers=("NCHW", "OIHW", "NCHW"))
    scale = params["gamma"] / jnp.sqrt(params["running_var"] + params["eps"])
    bias = params["beta"] - params["running_mean"] * scale
    y = y * scale[None, :, None, None] + bias[None, :, None, None]
    return jnp.maximum(y, 0.0)


if __name__ == "__main__":
    key = jax.random.PRNGKey(0)
    k_x, k_p3, k_p1, k_c, k_w, k_b = jax.random.split(key, 6)

    x = jax.random.normal(k_x, (2, 4, 16, 16), jnp.float32)   # NCHW, like PyTorch

    # ConvBNReLu(4, 256, kernel_size=3, stride=2, padding=1)  [weights-resident path]
    p3 = init_conv_bn_relu(k_p3, 4, 256, kernel_size=3, stride=2, padding=1)
    y3 = jax.block_until_ready(conv_bn_relu_forward(x, p3))
    assert y3.shape == (2, 256, 8, 8) and y3.dtype == jnp.float32, y3.shape
    ref3 = conv_bn_relu_reference(x, p3)
    err3 = float(jnp.max(jnp.abs(y3 - ref3)))
    assert err3 < 5e-2, f"3x3 max abs err {err3}"

    # ConvBNReLu(4, 256, kernel_size=1, stride=1, padding=0)  [weights-resident path]
    p1 = init_conv_bn_relu(k_p1, 4, 256, kernel_size=1, stride=1, padding=0)
    y1 = jax.block_until_ready(conv_bn_relu_forward(x, p1))
    assert y1.shape == (2, 256, 16, 16) and y1.dtype == jnp.float32, y1.shape
    ref1 = conv_bn_relu_reference(x, p1)
    err1 = float(jnp.max(jnp.abs(y1 - ref1)))
    assert err1 < 5e-2, f"1x1 max abs err {err1}"

    # Optional bf16 output path (halves store traffic; stores stay lane-dense).
    y1b = jax.block_until_ready(conv_bn_relu_forward(x, p1, out_dtype=jnp.bfloat16))
    assert y1b.dtype == jnp.bfloat16 and y1b.shape == (2, 256, 16, 16)
    errb = float(jnp.max(jnp.abs(y1b.astype(jnp.float32) - ref1)))
    assert errb < 1e-1, f"bf16-out max abs err {errb}"

    # Exercise the K-tiled fallback path directly (large-K layers).
    cols_big = 0.1 * jax.random.normal(k_c, (128, 1024), jnp.float32)
    w_big = 0.05 * jax.random.normal(k_w, (1024, 256), jnp.float32)
    b_big = 0.1 * jax.random.normal(k_b, (256,), jnp.float32)
    y_big = jax.block_until_ready(
        fused_matmul_bias_relu(cols_big, w_big, b_big, force_k_tiled=True))
    ref_big = jnp.maximum(
        cols_big.astype(jnp.bfloat16).astype(jnp.float32)
        @ w_big.astype(jnp.bfloat16).astype(jnp.float32) + b_big[None, :], 0.0)
    err_big = float(jnp.max(jnp.abs(y_big - ref_big)))
    assert err_big < 5e-2, f"k-tiled max abs err {err_big}"

    print("KERNEL_OK")
</pallas_src>

<mosaic_0001>
module attributes {stable_mosaic.version = 11 : i64} {
  func.func @_mm_bias_relu_kernel(%arg0: i32, %arg1: i32, %arg2: memref<128x128xbf16, #tpu.memory_space<vmem>>, %arg3: memref<128x256xbf16, #tpu.memory_space<vmem>>, %arg4: memref<1x256xf32, #tpu.memory_space<vmem>>, %arg5: memref<128x256xf32, #tpu.memory_space<vmem>>) attributes {dimension_semantics = [#tpu.dimension_semantics<parallel>, #tpu.dimension_semantics<parallel>], iteration_bounds = array<i64: 1, 1>, scalar_prefetch = 0 : i64, scratch_operands = 0 : i64, tpu.core_type = #tpu.core_type<tc>, window_params = [{transform_indices = @transform_0, window_bounds = array<i64: 128, 128>}, {transform_indices = @transform_1, window_bounds = array<i64: 128, 256>}, {transform_indices = @transform_2, window_bounds = array<i64: 1, 256>}, {transform_indices = @transform_3, window_bounds = array<i64: 128, 256>}]} {
    %c0 = arith.constant 0 : index
    %c0_0 = arith.constant 0 : index
    %0 = vector.load %arg2[%c0, %c0_0] : memref<128x128xbf16, #tpu.memory_space<vmem>>, vector<128x128xbf16>
    %c0_1 = arith.constant 0 : index
    %c0_2 = arith.constant 0 : index
    %1 = vector.load %arg3[%c0_1, %c0_2] : memref<128x256xbf16, #tpu.memory_space<vmem>>, vector<128x256xbf16>
    %cst = arith.constant dense<0.000000e+00> : vector<128x256xf32>
    %2 = tpu.matmul %0, %1, %cst {dimension_numbers = #tpu.dot_dimension_numbers<[1], [0], [0], [1], [0, 0, 1, 1], [], []>} : vector<128x128xbf16>, vector<128x256xbf16>, vector<128x256xf32> -> vector<128x256xf32>
    %c0_3 = arith.constant 0 : index
    %c0_4 = arith.constant 0 : index
    %3 = vector.load %arg4[%c0_3, %c0_4] : memref<1x256xf32, #tpu.memory_space<vmem>>, vector<1x256xf32>
    %4 = vector.broadcast %3 : vector<1x256xf32> to vector<128x256xf32>
    %5 = arith.addf %2, %4 : vector<128x256xf32>
    %cst_5 = arith.constant 0.000000e+00 : f32
    %6 = vector.broadcast %cst_5 : f32 to vector<128x256xf32>
    %7 = arith.maximumf %5, %6 : vector<128x256xf32>
    %c0_6 = arith.constant 0 : index
    %c0_7 = arith.constant 0 : index
    %8 = vector.load %arg5[%c0_6, %c0_7] : memref<128x256xf32, #tpu.memory_space<vmem>>, vector<128x256xf32>
    tpu.vector_store %arg5[%c0_6, %c0_7], %7 {strides = array<i32>} : memref<128x256xf32, #tpu.memory_space<vmem>>, vector<128x256xf32>,
    return
  }
  func.func @transform_0(%arg0: i32, %arg1: i32) -> (i32, i32) {
    %c0_i32 = arith.constant 0 : i32
    %c0_i32_0 = arith.constant 0 : i32
    return %arg0, %c0_i32 : i32, i32
  }
  func.func @transform_1(%arg0: i32, %arg1: i32) -> (i32, i32) {
    %c0_i32 = arith.constant 0 : i32
    %c0_i32_0 = arith.constant 0 : i32
    return %c0_i32, %arg1 : i32, i32
  }
  func.func @transform_2(%arg0: i32, %arg1: i32) -> (i32, i32) {
    %c0_i32 = arith.constant 0 : i32
    %c0_i32_0 = arith.constant 0 : i32
    return %c0_i32, %arg1 : i32, i32
  }
  func.func @transform_3(%arg0: i32, %arg1: i32) -> (i32, i32) {
    %c0_i32 = arith.constant 0 : i32
    return %arg0, %arg1 : i32, i32
  }
}

</mosaic_0001>

<bundles_post_ra>
// kernel: tpu_custom_call.1
= control target key start
LH: loop header
LB: loop body
LE: loop exit
PB: predicated region body
PF: predicated region fallthrough
CT: control target
= control target key end

     0   :  { %8 = vsyncpa [#allocation3], 0  ;;  %s645_s0 = inlined_call_operand.hbm [shape: bf16[128,128], index: 0, kind: input, shape index: {}]   ;;  %s646_s1 = inlined_call_operand.hbm [shape: bf16[128,256], index: 1, kind: input, shape index: {}]   ;;  %s647_s2 = inlined_call_operand.vmem [shape: f32[1,256], index: 2, kind: input, shape index: {}]   ;;  %s648_s3 = inlined_call_operand.hbm [shape: f32[128,256], index: 3, kind: output, shape index: {}]  }
   0x1   :  { %9 = vsyncpa [#allocation6], 0 }
   0x2   :  { %10 = vsyncpa [#allocation4], 0  ;;  %s559_s12 = smov [#allocation2]  }
   0x3   :  { %s16_s13 = sshll.u32 %s559_s12, 4  ;;  %s17_s13 = int_to_ptr.vmem [resolvable:$true] %s16_s13 }
   0x4   :  { %s501_s14 = scalar_lea.vmem %s17_s13, 1024  ;;  %p506_p1 = scmp.lt.s32.totalorder %s17_s13, %s17_s13 }
   0x5   :  { %p502_p0 = scmp.ne.s32.totalorder %s17_s13, %s501_s14  ;;  %p507_p2 = scmp.lt.s32.totalorder %s501_s14, %s501_s14 }
   0x7   :  { %p508_p3 = por %p507_p2, %p506_p1 }
   0x9   :  { %p509_p4 = pnand %p508_p3, %p502_p0 }
   0xb   :  { %512 = shalt.err (!%p509_p4)
}
   0xc   :  { %s560_s15 = smov 64   ;;  %s561_s16 = smov 4  }
   0xd   :  { %22 = dma.hbm_to_vmem [thread:$0]  %s645_s0, 1024, %s17_s13, [#allocation3], %s560_s15, %s560_s15, %s561_s16  }
   0xe   :  { %s562_s19 = smov [#allocation5]  }
   0xf   :  { %s28_s20 = sshll.u32 %s562_s19, 4  ;;  %s29_s20 = int_to_ptr.vmem [resolvable:$true] %s28_s20 }
  0x10   :  { %s521_s21 = scalar_lea.vmem %s29_s20, 2048  ;;  %p526_p6 = scmp.lt.s32.totalorder %s29_s20, %s29_s20 }
  0x11   :  { %p522_p5 = scmp.ne.s32.totalorder %s29_s20, %s521_s21  ;;  %p527_p7 = scmp.lt.s32.totalorder %s521_s21, %s521_s21 }
  0x13   :  { %p528_p8 = por %p527_p7, %p526_p6 }
  0x15   :  { %p529_p9 = pnand %p528_p8, %p522_p5 }
  0x17   :  { %532 = shalt.err (!%p529_p9)
}
  0x18   :  { %s563_s22 = smov 128   ;;  %s564_s23 = smov 8  }
  0x19   :  { %34 = dma.hbm_to_vmem [thread:$0]  %s646_s1, 2048, %s29_s20, [#allocation6], %s563_s22, %s563_s22, %s564_s23  }
  0x1a   :  { %553 = dma.done.wait [#allocation3], 1024  }
  0x1b   :  { %554 = vsyncadd [#allocation3], 4294966272 }
  0x1c   :  { %555 = dma.done.wait [#allocation6], 2048  }
  0x1d   :  { %556 = vsyncadd [#allocation6], 4294965248  ;;  %v565_v0 = vmov 0   ;;  %v461_v1 = vld [vmem:[#allocation5 + $0x74] ss:$8 sps:$4 sm:$0xff]   ;;  %v485_v17 = vld [vmem:[#allocation2] sm:$0xff]   ;;  %v78_v25 = vlaneseq }
  0x1e   :  { %248 = vmatprep.mubr.bf16.mxu0 %v565_v0  ;;  %288 = vmatprep.mubr.bf16.mxu1 %v565_v0  ;;  %v463_v2 = vld [vmem:[#allocation5 + $0x70] ss:$8 sps:$4 sm:$0xff]   ;;  %v464_v3 = vld [vmem:[#allocation5 + $0x64] ss:$8 sps:$4 sm:$0xff]   ;;  %v466_v4 = vld [vmem:[#allocation5 + $0x60] ss:$8 sps:$4 sm:$0xff]  }
  0x1f   :  { %216 = vmatprep.subr.bf16.mxu0 %v461_v1  ;;  %435 = vmatprep.subr.bf16.mxu1 %v461_v1  ;;  %v467_v5 = vld [vmem:[#allocation5 + $0x54] ss:$8 sps:$4 sm:$0xff]   ;;  %v469_v6 = vld [vmem:[#allocation5 + $0x50] ss:$8 sps:$4 sm:$0xff]   ;;  %v470_v7 = vld [vmem:[#allocation5 + $0x44] ss:$8 sps:$4 sm:$0xff]  }
  0x20   :  { %217 = vmatpush1.bf16.msra.mxu0 %v463_v2  ;;  %443 = vmatpush1.bf16.msra.mxu1 %v463_v2  ;;  %v472_v8 = vld [vmem:[#allocation5 + $0x40] ss:$8 sps:$4 sm:$0xff]   ;;  %v473_v9 = vld [vmem:[#allocation5 + $0x34] ss:$8 sps:$4 sm:$0xff]   ;;  %v475_v10 = vld [vmem:[#allocation5 + $0x30] ss:$8 sps:$4 sm:$0xff]  }
  0x21   :  { %218 = vmatprep.subr.bf16.mxu0 %v464_v3  ;;  %436 = vmatprep.subr.bf16.mxu1 %v464_v3  ;;  %v476_v11 = vld [vmem:[#allocation5 + $0x24] ss:$8 sps:$4 sm:$0xff]   ;;  %v478_v12 = vld [vmem:[#allocation5 + $0x20] ss:$8 sps:$4 sm:$0xff]   ;;  %v479_v13 = vld [vmem:[#allocation5 + $0x14] ss:$8 sps:$4 sm:$0xff]  }
  0x22   :  { %v481_v14 = vld [vmem:[#allocation5 + $0x10] ss:$8 sps:$4 sm:$0xff]   ;;  %v482_v15 = vld [vmem:[#allocation5 + $0x4] ss:$8 sps:$4 sm:$0xff]   ;;  %v484_v16 = vld [vmem:[#allocation5] ss:$8 sps:$4 sm:$0xff]  }
  0x23   :  { %v486_v18 = vld [vmem:[#allocation2 + $0x20] sm:$0xff]   ;;  %v487_v19 = vld [vmem:[#allocation2 + $0x8] sm:$0xff]   ;;  %v489_v21 = vld [vmem:[#allocation2 + $0x10] sm:$0xff]   ;;  %v79_v26 = vshrl.u32 %v78_v25, 7 }
  0x24   :  { %219 = vmatpush1.bf16.msra.mxu0 %v466_v4  ;;  %444 = vmatpush1.bf16.msra.mxu1 %v466_v4  ;;  %v488_v20 = vld [vmem:[#allocation2 + $0x28] sm:$0xff]   ;;  %v490_v22 = vld [vmem:[#allocation2 + $0x30] sm:$0xff]   ;;  %v491_v23 = vld [vmem:[#allocation2 + $0x18] sm:$0xff]  }
  0x25   :  { %220 = vmatprep.subr.bf16.mxu0 %v467_v5  ;;  %437 = vmatprep.subr.bf16.mxu1 %v467_v5  ;;  %v492_v24 = vld [vmem:[#allocation2 + $0x38] sm:$0xff]   ;;  %v80_v27 = vsub.s32 0, %v79_v26  ;;  %v76_v28 = vld [vmem:[%s647_s2] sm:$0x3]  ;;  %v84_v29 = vsub.s32 1, %v79_v26  ;;  %s566_s2 = smov [#allocation7]  }
  0x26   :  { %s398_s26 = sshll.u32 %s566_s2, 4  ;;  %s399_s26 = int_to_ptr.vmem [resolvable:$true] %s398_s26 }
  0x27   :  { %v606_v30 = vrot.slane %v76_v28, %v80_v27  ;;  %v608_v31 = vrot.slane %v76_v28, %v84_v29  ;;  %s533_s27 = scalar_lea.vmem %s399_s26, 4096  ;;  %p538_p11 = scmp.lt.s32.totalorder %s399_s26, %s399_s26 }
  0x28   :  { %221 = vmatpush1.bf16.msra.mxu0 %v469_v6  ;;  %445 = vmatpush1.bf16.msra.mxu1 %v469_v6  ;;  %p534_p10 = scmp.ne.s32.totalorder %s399_s26, %s533_s27  ;;  %p539_p12 = scmp.lt.s32.totalorder %s533_s27, %s533_s27 }
  0x29   :  { %222 = vmatprep.subr.bf16.mxu0 %v470_v7  ;;  %438 = vmatprep.subr.bf16.mxu1 %v470_v7 }
  0x2a   :  { %p540_p13 = por %p539_p12, %p538_p11 }
  0x2c   :  { %223 = vmatpush1.bf16.msra.mxu0 %v472_v8  ;;  %446 = vmatpush1.bf16.msra.mxu1 %v472_v8  ;;  %p541_p0 = pnand %p540_p13, %p534_p10 }
  0x2d   :  { %224 = vmatprep.subr.bf16.mxu0 %v473_v9  ;;  %439 = vmatprep.subr.bf16.mxu1 %v473_v9 }
  0x30   :  { %225 = vmatpush1.bf16.msra.mxu0 %v475_v10  ;;  %447 = vmatpush1.bf16.msra.mxu1 %v475_v10 }
  0x31   :  { %226 = vmatprep.subr.bf16.mxu0 %v476_v11  ;;  %440 = vmatprep.subr.bf16.mxu1 %v476_v11 }
  0x34   :  { %227 = vmatpush1.bf16.msra.mxu0 %v478_v12  ;;  %448 = vmatpush1.bf16.msra.mxu1 %v478_v12 }
  0x35   :  { %228 = vmatprep.subr.bf16.mxu0 %v479_v13  ;;  %441 = vmatprep.subr.bf16.mxu1 %v479_v13 }
  0x38   :  { %229 = vmatpush1.bf16.msra.mxu0 %v481_v14  ;;  %449 = vmatpush1.bf16.msra.mxu1 %v481_v14 }
  0x39   :  { %230 = vmatprep.subr.bf16.mxu0 %v482_v15  ;;  %442 = vmatprep.subr.bf16.mxu1 %v482_v15 }
  0x3c   :  { %231 = vmatpush1.bf16.msra.mxu0 %v484_v16  ;;  %450 = vmatpush1.bf16.msra.mxu1 %v484_v16 }
  0x3f   :  { %249 = vmatmul.mubr.bf16.vlgmr.msra.gmra.mxu0 %v485_v17  ;;  %289 = vmatmul.mubr.bf16.vlgmr.msra.gmra.mxu1 %v486_v18 }
  0x40   :  { %258 = vmatprep.mubr.bf16.mxu0 %v565_v0  ;;  %298 = vmatprep.mubr.bf16.mxu1 %v565_v0 }
  0x47   :  { %259 = vmatmul.mubr.bf16.gmra.mxu0 %v487_v19  ;;  %299 = vmatmul.mubr.bf16.gmra.mxu1 %v488_v20 }
  0x48   :  { %268 = vmatprep.mubr.bf16.mxu0 %v565_v0  ;;  %308 = vmatprep.mubr.bf16.mxu1 %v565_v0 }
  0x4f   :  { %269 = vmatmul.mubr.bf16.gmra.mxu0 %v489_v21  ;;  %309 = vmatmul.mubr.bf16.gmra.mxu1 %v490_v22 }
  0x50   :  { %278 = vmatprep.mubr.bf16.mxu0 %v565_v0  ;;  %318 = vmatprep.mubr.bf16.mxu1 %v565_v0 }
  0x57   :  { %279 = vmatmul.mubr.bf16.gmra.mxu0 %v491_v23  ;;  %319 = vmatmul.mubr.bf16.gmra.mxu1 %v492_v24 }
  0xff   :  { %v250_v32 = vpop.f32.mrf.mxu0  ;;  %v290_v33 = vpop.f32.mrf.mxu1 }
 0x100   :  { %v251_v34 = vadd.f32 %v250_v32, %v606_v30  ;;  %v291_v35 = vadd.f32 %v290_v33, %v606_v30 }
 0x101   :  { %v252_v36 = vpop.f32.mrf.mxu0  ;;  %v292_v37 = vpop.f32.mrf.mxu1 }
 0x102   :  { %v329_v38 = vmax.f32 %v251_v34, 0.0  ;;  %v345_v39 = vmax.f32 %v291_v35, 0.0  ;;  %v253_v40 = vadd.f32 %v252_v36, %v608_v31  ;;  %v293_v41 = vadd.f32 %v292_v37, %v608_v31 }
 0x103   :  { %v254_v42 = vpop.f32.mrf.mxu0  ;;  %v294_v43 = vpop.f32.mrf.mxu1 }
 0x104   :  { %361 = vst [vmem:[#allocation7] sm:$0xff] %v329_v38  ;;  %377 = vst [vmem:[#allocation7 + $0x80] sm:$0xff] %v345_v39  ;;  %v330_v44 = vmax.f32 %v253_v40, 0.0  ;;  %v346_v45 = vmax.f32 %v293_v41, 0.0  ;;  %v255_v46 = vadd.f32 %v254_v42, %v606_v30  ;;  %v295_v47 = vadd.f32 %v294_v43, %v606_v30 }
 0x105   :  { %v256_v48 = vpop.f32.mrf.mxu0  ;;  %v296_v49 = vpop.f32.mrf.mxu1 }
 0x106   :  { %362 = vst [vmem:[#allocation7 + $0x8] sm:$0xff] %v330_v44  ;;  %378 = vst [vmem:[#allocation7 + $0x88] sm:$0xff] %v346_v45  ;;  %v331_v50 = vmax.f32 %v255_v46, 0.0  ;;  %v347_v51 = vmax.f32 %v295_v47, 0.0  ;;  %v257_v52 = vadd.f32 %v256_v48, %v608_v31  ;;  %v297_v53 = vadd.f32 %v296_v49, %v608_v31 }
 0x107   :  { %v260_v54 = vpop.f32.mrf.mxu0  ;;  %v300_v55 = vpop.f32.mrf.mxu1 }
 0x108   :  { %363 = vst [vmem:[#allocation7 + $0x10] sm:$0xff] %v331_v50  ;;  %379 = vst [vmem:[#allocation7 + $0x90] sm:$0xff] %v347_v51  ;;  %v332_v56 = vmax.f32 %v257_v52, 0.0  ;;  %v348_v57 = vmax.f32 %v297_v53, 0.0  ;;  %v261_v58 = vadd.f32 %v260_v54, %v606_v30  ;;  %v301_v59 = vadd.f32 %v300_v55, %v606_v30 }
 0x109   :  { %v262_v60 = vpop.f32.mrf.mxu0  ;;  %v302_v61 = vpop.f32.mrf.mxu1 }
 0x10a   :  { %364 = vst [vmem:[#allocation7 + $0x18] sm:$0xff] %v332_v56  ;;  %380 = vst [vmem:[#allocation7 + $0x98] sm:$0xff] %v348_v57  ;;  %v333_v62 = vmax.f32 %v261_v58, 0.0  ;;  %v349_v63 = vmax.f32 %v301_v59, 0.0  ;;  %v263_v0 = vadd.f32 %v262_v60, %v608_v31  ;;  %v303_v1 = vadd.f32 %v302_v61, %v608_v31 }
 0x10b   :  { %v264_v2 = vpop.f32.mrf.mxu0  ;;  %v304_v3 = vpop.f32.mrf.mxu1 }
 0x10c   :  { %365 = vst [vmem:[#allocation7 + $0x20] sm:$0xff] %v333_v62  ;;  %381 = vst [vmem:[#allocation7 + $0xa0] sm:$0xff] %v349_v63  ;;  %v334_v4 = vmax.f32 %v263_v0, 0.0  ;;  %v350_v5 = vmax.f32 %v303_v1, 0.0  ;;  %v265_v6 = vadd.f32 %v264_v2, %v606_v30  ;;  %v305_v7 = vadd.f32 %v304_v3, %v606_v30 }
 0x10d   :  { %v266_v8 = vpop.f32.mrf.mxu0  ;;  %v306_v9 = vpop.f32.mrf.mxu1 }
 0x10e   :  { %366 = vst [vmem:[#allocation7 + $0x28] sm:$0xff] %v334_v4  ;;  %382 = vst [vmem:[#allocation7 + $0xa8] sm:$0xff] %v350_v5  ;;  %v335_v10 = vmax.f32 %v265_v6, 0.0  ;;  %v351_v11 = vmax.f32 %v305_v7, 0.0  ;;  %v267_v12 = vadd.f32 %v266_v8, %v608_v31  ;;  %v307_v13 = vadd.f32 %v306_v9, %v608_v31 }
 0x10f   :  { %v270_v14 = vpop.f32.mrf.mxu0  ;;  %v310_v15 = vpop.f32.mrf.mxu1 }
 0x110   :  { %367 = vst [vmem:[#allocation7 + $0x30] sm:$0xff] %v335_v10  ;;  %383 = vst [vmem:[#allocation7 + $0xb0] sm:$0xff] %v351_v11  ;;  %v336_v16 = vmax.f32 %v267_v12, 0.0  ;;  %v352_v17 = vmax.f32 %v307_v13, 0.0  ;;  %v271_v18 = vadd.f32 %v270_v14, %v606_v30  ;;  %v311_v19 = vadd.f32 %v310_v15, %v606_v30 }
 0x111   :  { %v272_v20 = vpop.f32.mrf.mxu0  ;;  %v312_v21 = vpop.f32.mrf.mxu1 }
 0x112   :  { %368 = vst [vmem:[#allocation7 + $0x38] sm:$0xff] %v336_v16  ;;  %384 = vst [vmem:[#allocation7 + $0xb8] sm:$0xff] %v352_v17  ;;  %v337_v22 = vmax.f32 %v271_v18, 0.0  ;;  %v353_v23 = vmax.f32 %v311_v19, 0.0  ;;  %v273_v24 = vadd.f32 %v272_v20, %v608_v31  ;;  %v313_v25 = vadd.f32 %v312_v21, %v608_v31 }
 0x113   :  { %v274_v26 = vpop.f32.mrf.mxu0  ;;  %v314_v27 = vpop.f32.mrf.mxu1 }
 0x114   :  { %369 = vst [vmem:[#allocation7 + $0x40] sm:$0xff] %v337_v22  ;;  %385 = vst [vmem:[#allocation7 + $0xc0] sm:$0xff] %v353_v23  ;;  %v338_v28 = vmax.f32 %v273_v24, 0.0  ;;  %v354_v29 = vmax.f32 %v313_v25, 0.0  ;;  %v275_v32 = vadd.f32 %v274_v26, %v606_v30  ;;  %v315_v33 = vadd.f32 %v314_v27, %v606_v30 }
 0x115   :  { %v276_v34 = vpop.f32.mrf.mxu0  ;;  %v316_v35 = vpop.f32.mrf.mxu1 }
 0x116   :  { %370 = vst [vmem:[#allocation7 + $0x48] sm:$0xff] %v338_v28  ;;  %386 = vst [vmem:[#allocation7 + $0xc8] sm:$0xff] %v354_v29  ;;  %v339_v36 = vmax.f32 %v275_v32, 0.0  ;;  %v355_v37 = vmax.f32 %v315_v33, 0.0  ;;  %v277_v38 = vadd.f32 %v276_v34, %v608_v31  ;;  %v317_v39 = vadd.f32 %v316_v35, %v608_v31 }
 0x117   :  { %v280_v40 = vpop.f32.mrf.mxu0  ;;  %v320_v41 = vpop.f32.mrf.mxu1 }
 0x118   :  { %371 = vst [vmem:[#allocation7 + $0x50] sm:$0xff] %v339_v36  ;;  %387 = vst [vmem:[#allocation7 + $0xd0] sm:$0xff] %v355_v37  ;;  %v340_v42 = vmax.f32 %v277_v38, 0.0  ;;  %v356_v43 = vmax.f32 %v317_v39, 0.0  ;;  %v281_v44 = vadd.f32 %v280_v40, %v606_v30  ;;  %v321_v45 = vadd.f32 %v320_v41, %v606_v30 }
 0x119   :  { %v282_v46 = vpop.f32.mrf.mxu0  ;;  %v322_v47 = vpop.f32.mrf.mxu1 }
 0x11a   :  { %372 = vst [vmem:[#allocation7 + $0x58] sm:$0xff] %v340_v42  ;;  %388 = vst [vmem:[#allocation7 + $0xd8] sm:$0xff] %v356_v43  ;;  %v341_v48 = vmax.f32 %v281_v44, 0.0  ;;  %v357_v49 = vmax.f32 %v321_v45, 0.0  ;;  %v283_v50 = vadd.f32 %v282_v46, %v608_v31  ;;  %v323_v51 = vadd.f32 %v322_v47, %v608_v31 }
 0x11b   :  { %v284_v52 = vpop.f32.mrf.mxu0  ;;  %v324_v53 = vpop.f32.mrf.mxu1 }
 0x11c   :  { %373 = vst [vmem:[#allocation7 + $0x60] sm:$0xff] %v341_v48  ;;  %389 = vst [vmem:[#allocation7 + $0xe0] sm:$0xff] %v357_v49  ;;  %v342_v54 = vmax.f32 %v283_v50, 0.0  ;;  %v358_v55 = vmax.f32 %v323_v51, 0.0  ;;  %v285_v56 = vadd.f32 %v284_v52, %v606_v30  ;;  %v325_v57 = vadd.f32 %v324_v53, %v606_v30 }
 0x11d   :  { %v286_v58 = vpop.f32.mrf.mxu0  ;;  %v326_v59 = vpop.f32.mrf.mxu1 }
 0x11e   :  { %374 = vst [vmem:[#allocation7 + $0x68] sm:$0xff] %v342_v54  ;;  %390 = vst [vmem:[#allocation7 + $0xe8] sm:$0xff] %v358_v55  ;;  %v343_v60 = vmax.f32 %v285_v56, 0.0  ;;  %v359_v61 = vmax.f32 %v325_v57, 0.0  ;;  %v287_v62 = vadd.f32 %v286_v58, %v608_v31  ;;  %v327_v63 = vadd.f32 %v326_v59, %v608_v31 }
 0x120   :  { %375 = vst [vmem:[#allocation7 + $0x70] sm:$0xff] %v343_v60  ;;  %391 = vst [vmem:[#allocation7 + $0xf0] sm:$0xff] %v359_v61  ;;  %v344_v0 = vmax.f32 %v287_v62, 0.0  ;;  %v360_v1 = vmax.f32 %v327_v63, 0.0 }
 0x122   :  { %376 = vst [vmem:[#allocation7 + $0x78] sm:$0xff] %v344_v0  ;;  %392 = vst [vmem:[#allocation7 + $0xf8] sm:$0xff] %v360_v1 }
 0x123   :  { %544 = shalt.err (!%p541_p0)
}
 0x124   :  { %s567_s28 = smov 256   ;;  %s568_s29 = smov 16  }
 0x125   :  { %404 = dma.vmem_to_hbm [thread:$0]  %s399_s26, 4096, %s648_s3, [#allocation4], %s567_s28, %s567_s28, %s568_s29  }
 0x126   :  { %557 = dma.done.wait [#allocation4], 4096  }
 0x127   :  { %558 = vsyncadd [#allocation4], 4294963200 }
 0x128   :  { %408 = vsyncpa [#allocation3], 1 }
 0x129   :  { %409 = vsyncpa [#allocation6], 1 }
 0x12a   :  { %410 = vsyncpa [#allocation4], 1 }

</bundles_post_ra>
